<compile_context>
chip_gen: v7x
topology: tpu7x:2x2x1
jax: 0.10.0
libtpu: 0.0.40
codegen_flags: <defaults>
</compile_context>

<pallas_src>
import jax
import jax.numpy as jnp
from jax.experimental import pallas as pl
from jax.experimental.pallas import tpu as pltpu

# ---------------- FTCN hyper-parameters --------------------------------------
B, T = 2, 8                        # batch, time steps
N_SCALARS = 2
N_PROFILES = 2
PROFILE_SIZE = 16
CHANNELS_SPATIAL = ["c4"]          # one classical Conv1d, 4 out channels
KERNEL_SPATIAL = 3
LINEAR_SIZES = [8]
CHANNELS_TEMPORAL = ["c8", "c8"]   # two classical TemporalBlocks
KERNEL_TEMPORAL = 2
OUTPUT_SIZE = 1

C_SP = int(CHANNELS_SPATIAL[0][1:])                  # 4
C_T0 = int(CHANNELS_TEMPORAL[0][1:])                 # 8
C_T1 = int(CHANNELS_TEMPORAL[1][1:])                 # 8
N = B * T                                            # 16 flattened rows
L_CONV = PROFILE_SIZE - KERNEL_SPATIAL + 1           # 14
L_POOL = L_CONV // 2                                 # 7  (MaxPool1d(2))
CONV_FLAT = C_SP * L_POOL                            # 28
LIN_FINAL = LINEAR_SIZES[-1]                         # 8
TCN_IN = LIN_FINAL + N_SCALARS                       # 10
FEATURES = N_SCALARS + N_PROFILES * PROFILE_SIZE     # 34
KC_SP = KERNEL_SPATIAL * N_PROFILES                  # 6  (im2col width)
WIDE_SP = L_POOL * KC_SP                             # 42 (block-diag im2col)

# ---------------- packed-slab layout ------------------------------------------
ACT_W = 64          # activation slab lane width: [scalars(2) | taps(42) | pad]
TAP_OFF = N_SCALARS
LANES_W = 128       # weight slab lane width (lane-dense single DMA)


def _align8(r):
    return (r + 7) & ~7


# row offsets inside the packed weight slab (each block 8-row aligned so every
# in-kernel static slice starts sublane-aligned).
R_WSP = 0                                   # (ACT_W, 28) spatial block-diag
R_BSP = R_WSP + ACT_W                       # (1, 28)
R_WL0 = _align8(R_BSP + 1)                  # (28, 8)
R_BL0 = _align8(R_WL0 + CONV_FLAT)          # (1, 8)
R_W01 = _align8(R_BL0 + 1)                  # (2*10, 8)  block0 conv1 (fused taps)
R_B01 = _align8(R_W01 + 2 * TCN_IN)         # (1, 8)
R_W02 = _align8(R_B01 + 1)                  # (2*8, 8)   block0 conv2
R_B02 = _align8(R_W02 + 2 * C_T0)           # (1, 8)
R_W0D = _align8(R_B02 + 1)                  # (10, 8)    block0 1x1 residual
R_B0D = _align8(R_W0D + TCN_IN)             # (1, 8)
R_W11 = _align8(R_B0D + 1)                  # (2*8, 8)   block1 conv1
R_B11 = _align8(R_W11 + 2 * C_T0)           # (1, 8)
R_W12 = _align8(R_B11 + 1)                  # (2*8, 8)   block1 conv2
R_B12 = _align8(R_W12 + 2 * C_T1)           # (1, 8)
R_WOUT = _align8(R_B12 + 1)                 # (8, 1)
R_BOUT = _align8(R_WOUT + LIN_FINAL)        # (1, 1)
W_ROWS = _align8(R_BOUT + 1)                # 256


# ---------------- the fused kernel --------------------------------------------
def _ftcn_kernel(acts_ref, w_ref, o_ref):
    f32 = jnp.float32

    # ---- read the packed parameters (static slices, zero runtime cost) ------
    w_sp = w_ref[R_WSP:R_WSP + ACT_W, 0:CONV_FLAT]       # (64, 28)
    b_sp = w_ref[R_BSP:R_BSP + 1, 0:CONV_FLAT]           # (1, 28)
    w_l0 = w_ref[R_WL0:R_WL0 + CONV_FLAT, 0:LIN_FINAL]   # (28, 8)
    b_l0 = w_ref[R_BL0:R_BL0 + 1, 0:LIN_FINAL]
    w0_1 = w_ref[R_W01:R_W01 + 2 * TCN_IN, 0:C_T0]       # (20, 8)
    b0_1 = w_ref[R_B01:R_B01 + 1, 0:C_T0]
    w0_2 = w_ref[R_W02:R_W02 + 2 * C_T0, 0:C_T0]         # (16, 8)
    b0_2 = w_ref[R_B02:R_B02 + 1, 0:C_T0]
    w0_d = w_ref[R_W0D:R_W0D + TCN_IN, 0:C_T0]           # (10, 8)
    b0_d = w_ref[R_B0D:R_B0D + 1, 0:C_T0]
    w1_1 = w_ref[R_W11:R_W11 + 2 * C_T0, 0:C_T1]         # (16, 8)
    b1_1 = w_ref[R_B11:R_B11 + 1, 0:C_T1]
    w1_2 = w_ref[R_W12:R_W12 + 2 * C_T1, 0:C_T1]         # (16, 8)
    b1_2 = w_ref[R_B12:R_B12 + 1, 0:C_T1]
    w_out = w_ref[R_WOUT:R_WOUT + LIN_FINAL, 0:OUTPUT_SIZE]
    b_out = w_ref[R_BOUT:R_BOUT + 1, 0:OUTPUT_SIZE]

    # ---- InputBlock: Conv1d + ReLU + MaxPool1d(2) + flatten + Linear + ReLU --
    # Both pooling parities are stacked along M (rows 0:N even, N:2N odd); one
    # MXU dot against the block-diagonal im2col weight.  Scalar lanes hit zero
    # weight rows.  MaxPool1d(2) = elementwise max of the two row halves; the
    # PyTorch (N, C, L) flatten order is pre-folded into lin0's weight.
    acts = acts_ref[...]                                            # (2N, 64)
    conv = jnp.dot(acts, w_sp, preferred_element_type=f32) + b_sp
    conv = jnp.maximum(conv, 0.0)                                   # (2N, 28)
    feat = jnp.maximum(conv[0:N, :], conv[N:2 * N, :])              # (N, 28)
    prof = jnp.maximum(
        jnp.dot(feat, w_l0, preferred_element_type=f32) + b_l0, 0.0)  # (N, 8)

    x_scal = acts[0:N, 0:N_SCALARS]                                 # (N, 2)
    full = jnp.concatenate([x_scal, prof], axis=1)                  # (N, 10)

    # ---- batch-boundary masks, generated in-kernel ---------------------------
    row = jax.lax.broadcasted_iota(jnp.int32, (N, 1), 0)
    if (T & (T - 1)) == 0:
        t_idx = jnp.bitwise_and(row, T - 1)          # row % T (T power of two)
    else:
        t_idx = row % T
    m1 = (t_idx >= 1).astype(f32)
    m2 = (t_idx >= 2).astype(f32)

    def causal_conv(slab, dil, mask, w_cat, b):
        # y[b, t] = relu(W[0]^T x[b, t-dil] + W[1]^T x[b, t] + b), causal.
        # Shift = XLU roll along rows; the mask zeroes rows whose shifted read
        # would wrap around the flattened (batch, time) boundary.  Both taps go
        # through one MXU dot against the pre-concatenated [W0; W1].
        shifted = pltpu.roll(slab, shift=dil, axis=0) * mask
        lhs = jnp.concatenate([shifted, slab], axis=1)
        y = jnp.dot(lhs, w_cat, preferred_element_type=f32) + b
        return jnp.maximum(y, 0.0)

    # ---- TemporalBlock 0: dilation 1, 10 -> 8, 1x1-conv residual -------------
    h1 = causal_conv(full, 1, m1, w0_1, b0_1)
    h2 = causal_conv(h1, 1, m1, w0_2, b0_2)
    res = jnp.dot(full, w0_d, preferred_element_type=f32) + b0_d
    hb0 = jnp.maximum(h2 + res, 0.0)

    # ---- TemporalBlock 1: dilation 2, 8 -> 8, identity residual --------------
    g1 = causal_conv(hb0, 2, m2, w1_1, b1_1)
    g2 = causal_conv(g1, 2, m2, w1_2, b1_2)
    hb1 = jnp.maximum(g2 + hb0, 0.0)

    # ---- output Linear (single whole-tile store) ------------------------------
    o_ref[...] = jnp.dot(hb1, w_out, preferred_element_type=f32) + b_out


# ---------------- wrapper ------------------------------------------------------
def _full_spec(shape):
    nd = len(shape)
    return pl.BlockSpec(shape, lambda i, _nd=nd: (0,) * _nd)


def ftcn_forward(x, params):
    # x: (B, T, n_scalars + n_profiles * profile_size)
    bb, t_len, _ = x.shape
    n = bb * t_len
    xf = x.reshape(n, FEATURES)                        # TimeDistributed flatten
    x_scal = xf[:, :N_SCALARS]
    x_prof = xf[:, N_SCALARS:].reshape(n, N_PROFILES, PROFILE_SIZE)
    x_nlc = jnp.transpose(x_prof, (0, 2, 1))           # NCL -> NLC

    # Spatial-conv im2col split by pooling parity (layout plumbing only):
    # x_even[n, j*6 + k*2 + c] = x_nlc[n, 2j + k, c], x_odd likewise for 2j+1.
    taps = jnp.concatenate(
        [x_nlc[:, k:k + L_CONV, :] for k in range(KERNEL_SPATIAL)], axis=-1)
    x_even = taps[:, 0::2, :].reshape(n, WIDE_SP)
    x_odd = taps[:, 1::2, :].reshape(n, WIDE_SP)

    # Single packed activation slab: rows 0:n = even parity, n:2n = odd parity;
    # lanes [0:2] scalars (even rows only), [2:44] im2col taps, rest zero.
    acts = jnp.zeros((2 * n, ACT_W), jnp.float32)
    acts = acts.at[:n, :N_SCALARS].set(x_scal)
    acts = acts.at[:n, TAP_OFF:TAP_OFF + WIDE_SP].set(x_even)
    acts = acts.at[n:, TAP_OFF:TAP_OFF + WIDE_SP].set(x_odd)

    out = pl.pallas_call(
        _ftcn_kernel,
        out_shape=jax.ShapeDtypeStruct((n, OUTPUT_SIZE), jnp.float32),
        grid=(1,),
        in_specs=[_full_spec(acts.shape), _full_spec(params["w_slab"].shape)],
        out_specs=_full_spec((n, OUTPUT_SIZE)),
        compiler_params=pltpu.CompilerParams(
            dimension_semantics=("arbitrary",)),
        cost_estimate=pl.CostEstimate(
            flops=150_000, transcendentals=0, bytes_accessed=140_000),
    )(acts, params["w_slab"])
    return out.reshape(bb, t_len, OUTPUT_SIZE)


# ---------------- deterministic parameter init ---------------------------------
def init_params(key):
    ks = jax.random.split(key, 16)
    s = 0.1
    # PyTorch-layout-equivalent weights (same shapes/distributions as before).
    sp_w = s * jax.random.normal(ks[0], (KERNEL_SPATIAL, N_PROFILES, C_SP))
    sp_b = s * jax.random.normal(ks[1], (C_SP,))
    lin0_w = s * jax.random.normal(ks[2], (CONV_FLAT, LIN_FINAL))  # row = co*7+j
    lin0_b = s * jax.random.normal(ks[3], (LIN_FINAL,))
    b0_w1 = s * jax.random.normal(ks[4], (KERNEL_TEMPORAL, TCN_IN, C_T0))
    b0_b1 = s * jax.random.normal(ks[5], (C_T0,))
    b0_w2 = s * jax.random.normal(ks[6], (KERNEL_TEMPORAL, C_T0, C_T0))
    b0_b2 = s * jax.random.normal(ks[7], (C_T0,))
    b0_wd = s * jax.random.normal(ks[8], (TCN_IN, C_T0))
    b0_bd = s * jax.random.normal(ks[9], (C_T0,))
    b1_w1 = s * jax.random.normal(ks[10], (KERNEL_TEMPORAL, C_T0, C_T1))
    b1_b1 = s * jax.random.normal(ks[11], (C_T1,))
    b1_w2 = s * jax.random.normal(ks[12], (KERNEL_TEMPORAL, C_T1, C_T1))
    b1_b2 = s * jax.random.normal(ks[13], (C_T1,))
    out_w = s * jax.random.normal(ks[14], (LIN_FINAL, OUTPUT_SIZE))
    out_b = s * jax.random.normal(ks[15], (OUTPUT_SIZE,))

    # --- free load-time layout folding ----------------------------------------
    # Spatial conv as a block-diagonal (pool position x (tap, in-channel))
    # matrix: conv + relu + maxpool yield a lane-dense (N, 28) slab directly.
    w_sp_flat = sp_w.reshape(KC_SP, C_SP)                        # row = k*C_in+c
    w_sp_block = jnp.einsum("jJ,fc->jfJc", jnp.eye(L_POOL), w_sp_flat)
    w_sp_block = w_sp_block.reshape(WIDE_SP, CONV_FLAT)          # (42, 28)
    b_sp_tiled = jnp.tile(sp_b, L_POOL).reshape(1, CONV_FLAT)    # col = j*4+co
    # Fold PyTorch's (N, C, L) flatten order (row co*7+j) into lin0's weight so
    # the kernel needs no transpose: new row index = j*4 + co.
    lin0_perm = lin0_w.reshape(C_SP, L_POOL, LIN_FINAL)
    lin0_perm = jnp.transpose(lin0_perm, (1, 0, 2)).reshape(CONV_FLAT, LIN_FINAL)

    # --- pack everything into ONE lane-dense slab (single input DMA) ----------
    W = jnp.zeros((W_ROWS, LANES_W), jnp.float32)

    def put(slab, r, arr):
        arr = jnp.asarray(arr, jnp.float32)
        if arr.ndim == 1:
            arr = arr.reshape(1, -1)
        return slab.at[r:r + arr.shape[0], :arr.shape[1]].set(arr)

    # spatial weight rows line up with the activation-slab lanes:
    # rows [0:2] (scalar lanes) and [44:64] (padding) stay zero.
    W = put(W, R_WSP + TAP_OFF, w_sp_block)
    W = put(W, R_BSP, b_sp_tiled)
    W = put(W, R_WL0, lin0_perm)
    W = put(W, R_BL0, lin0_b)
    # temporal convs: fuse the 2 taps -> rows [0:C_in]=W[0] (t-dil), rest=W[1].
    W = put(W, R_W01, b0_w1.reshape(2 * TCN_IN, C_T0))
    W = put(W, R_B01, b0_b1)
    W = put(W, R_W02, b0_w2.reshape(2 * C_T0, C_T0))
    W = put(W, R_B02, b0_b2)
    W = put(W, R_W0D, b0_wd)
    W = put(W, R_B0D, b0_bd)
    W = put(W, R_W11, b1_w1.reshape(2 * C_T0, C_T1))
    W = put(W, R_B11, b1_b1)
    W = put(W, R_W12, b1_w2.reshape(2 * C_T1, C_T1))
    W = put(W, R_B12, b1_b2)
    W = put(W, R_WOUT, out_w)
    W = put(W, R_BOUT, out_b)
    return {"w_slab": W}


if __name__ == "__main__":
    key = jax.random.PRNGKey(0)
    kx, kp = jax.random.split(key)
    params = init_params(kp)
    x = jax.random.normal(kx, (B, T, FEATURES), dtype=jnp.float32)

    y = jax.jit(ftcn_forward)(x, params)
    jax.block_until_ready(y)
    assert y.shape == (B, T, OUTPUT_SIZE)
    assert bool(jnp.all(jnp.isfinite(y)))
    print("KERNEL_OK")
</pallas_src>

<mosaic_0001>
module attributes {stable_mosaic.version = 11 : i64} {
  func.func @_ftcn_kernel(%arg0: i32, %arg1: memref<32x64xf32, #tpu.memory_space<vmem>>, %arg2: memref<256x128xf32, #tpu.memory_space<vmem>>, %arg3: memref<16x1xf32, #tpu.memory_space<vmem>>) attributes {dimension_semantics = [#tpu.dimension_semantics<arbitrary>], iteration_bounds = array<i64: 1>, scalar_prefetch = 0 : i64, scratch_operands = 0 : i64, tpu.core_type = #tpu.core_type<tc>, window_params = [{pipeline_mode = #tpu.pipeline_mode<synchronous>, transform_indices = @transform_0, window_bounds = array<i64: 32, 64>}, {pipeline_mode = #tpu.pipeline_mode<synchronous>, transform_indices = @transform_1, window_bounds = array<i64: 256, 128>}, {pipeline_mode = #tpu.pipeline_mode<synchronous>, transform_indices = @transform_2, window_bounds = array<i64: 16, 1>}]} {
    %c0 = arith.constant 0 : index
    %c0_0 = arith.constant 0 : index
    %0 = vector.load %arg2[%c0, %c0_0] : memref<256x128xf32, #tpu.memory_space<vmem>>, vector<64x28xf32>
    %c64 = arith.constant 64 : index
    %c0_1 = arith.constant 0 : index
    %1 = vector.load %arg2[%c64, %c0_1] : memref<256x128xf32, #tpu.memory_space<vmem>>, vector<1x28xf32>
    %c72 = arith.constant 72 : index
    %c0_2 = arith.constant 0 : index
    %2 = vector.load %arg2[%c72, %c0_2] : memref<256x128xf32, #tpu.memory_space<vmem>>, vector<28x8xf32>
    %c104 = arith.constant 104 : index
    %c0_3 = arith.constant 0 : index
    %3 = vector.load %arg2[%c104, %c0_3] : memref<256x128xf32, #tpu.memory_space<vmem>>, vector<1x8xf32>
    %c112 = arith.constant 112 : index
    %c0_4 = arith.constant 0 : index
    %4 = vector.load %arg2[%c112, %c0_4] : memref<256x128xf32, #tpu.memory_space<vmem>>, vector<20x8xf32>
    %c136 = arith.constant 136 : index
    %c0_5 = arith.constant 0 : index
    %5 = vector.load %arg2[%c136, %c0_5] : memref<256x128xf32, #tpu.memory_space<vmem>>, vector<1x8xf32>
    %c144 = arith.constant 144 : index
    %c0_6 = arith.constant 0 : index
    %6 = vector.load %arg2[%c144, %c0_6] : memref<256x128xf32, #tpu.memory_space<vmem>>, vector<16x8xf32>
    %c160 = arith.constant 160 : index
    %c0_7 = arith.constant 0 : index
    %7 = vector.load %arg2[%c160, %c0_7] : memref<256x128xf32, #tpu.memory_space<vmem>>, vector<1x8xf32>
    %c168 = arith.constant 168 : index
    %c0_8 = arith.constant 0 : index
    %8 = vector.load %arg2[%c168, %c0_8] : memref<256x128xf32, #tpu.memory_space<vmem>>, vector<10x8xf32>
    %c184 = arith.constant 184 : index
    %c0_9 = arith.constant 0 : index
    %9 = vector.load %arg2[%c184, %c0_9] : memref<256x128xf32, #tpu.memory_space<vmem>>, vector<1x8xf32>
    %c192 = arith.constant 192 : index
    %c0_10 = arith.constant 0 : index
    %10 = vector.load %arg2[%c192, %c0_10] : memref<256x128xf32, #tpu.memory_space<vmem>>, vector<16x8xf32>
    %c208 = arith.constant 208 : index
    %c0_11 = arith.constant 0 : index
    %11 = vector.load %arg2[%c208, %c0_11] : memref<256x128xf32, #tpu.memory_space<vmem>>, vector<1x8xf32>
    %c216 = arith.constant 216 : index
    %c0_12 = arith.constant 0 : index
    %12 = vector.load %arg2[%c216, %c0_12] : memref<256x128xf32, #tpu.memory_space<vmem>>, vector<16x8xf32>
    %c232 = arith.constant 232 : index
    %c0_13 = arith.constant 0 : index
    %13 = vector.load %arg2[%c232, %c0_13] : memref<256x128xf32, #tpu.memory_space<vmem>>, vector<1x8xf32>
    %c240 = arith.constant 240 : index
    %c0_14 = arith.constant 0 : index
    %14 = vector.load %arg2[%c240, %c0_14] : memref<256x128xf32, #tpu.memory_space<vmem>>, vector<8x1xf32>
    %c248 = arith.constant 248 : index
    %c0_15 = arith.constant 0 : index
    %15 = vector.load %arg2[%c248, %c0_15] : memref<256x128xf32, #tpu.memory_space<vmem>>, vector<1x1xf32>
    %c0_16 = arith.constant 0 : index
    %c0_17 = arith.constant 0 : index
    %16 = vector.load %arg1[%c0_16, %c0_17] : memref<32x64xf32, #tpu.memory_space<vmem>>, vector<32x64xf32>
    %cst = arith.constant dense<0.000000e+00> : vector<32x28xf32>
    %17 = tpu.matmul %16, %0, %cst {dimension_numbers = #tpu.dot_dimension_numbers<[1], [0], [0], [1], [0, 0, 1, 1], [], []>} : vector<32x64xf32>, vector<64x28xf32>, vector<32x28xf32> -> vector<32x28xf32>
    %18 = vector.broadcast %1 : vector<1x28xf32> to vector<32x28xf32>
    %19 = arith.addf %17, %18 : vector<32x28xf32>
    %cst_18 = arith.constant 0.000000e+00 : f32
    %20 = vector.broadcast %cst_18 : f32 to vector<32x28xf32>
    %21 = arith.maximumf %19, %20 : vector<32x28xf32>
    %22 = vector.extract_strided_slice %21 {offsets = [0, 0], sizes = [16, 28], strides = [1, 1]} : vector<32x28xf32> to vector<16x28xf32>
    %23 = vector.extract_strided_slice %21 {offsets = [16, 0], sizes = [16, 28], strides = [1, 1]} : vector<32x28xf32> to vector<16x28xf32>
    %24 = arith.maximumf %22, %23 : vector<16x28xf32>
    %cst_19 = arith.constant dense<0.000000e+00> : vector<16x8xf32>
    %25 = tpu.matmul %24, %2, %cst_19 {dimension_numbers = #tpu.dot_dimension_numbers<[1], [0], [0], [1], [0, 0, 1, 1], [], []>} : vector<16x28xf32>, vector<28x8xf32>, vector<16x8xf32> -> vector<16x8xf32>
    %26 = vector.broadcast %3 : vector<1x8xf32> to vector<16x8xf32>
    %27 = arith.addf %25, %26 : vector<16x8xf32>
    %cst_20 = arith.constant 0.000000e+00 : f32
    %28 = vector.broadcast %cst_20 : f32 to vector<16x8xf32>
    %29 = arith.maximumf %27, %28 : vector<16x8xf32>
    %30 = vector.extract_strided_slice %16 {offsets = [0, 0], sizes = [16, 2], strides = [1, 1]} : vector<32x64xf32> to vector<16x2xf32>
    %31 = tpu.concatenate %30, %29 in 1 : vector<16x2xf32>, vector<16x8xf32> -> vector<16x10xf32>
    %32 = tpu.iota {dimensions = array<i32: 0>} : vector<16x1xi32>
    %c7_i32 = arith.constant 7 : i32
    %33 = vector.broadcast %c7_i32 : i32 to vector<16x1xi32>
    %34 = arith.andi %32, %33 : vector<16x1xi32>
    %c1_i32 = arith.constant 1 : i32
    %35 = vector.broadcast %c1_i32 : i32 to vector<16x1xi32>
    %36 = arith.cmpi sge, %34, %35 : vector<16x1xi32>
    %37 = arith.extui %36 : vector<16x1xi1> to vector<16x1xi32>
    %38 = arith.sitofp %37 : vector<16x1xi32> to vector<16x1xf32>
    %c2_i32 = arith.constant 2 : i32
    %39 = vector.broadcast %c2_i32 : i32 to vector<16x1xi32>
    %40 = arith.cmpi sge, %34, %39 : vector<16x1xi32>
    %41 = arith.extui %40 : vector<16x1xi1> to vector<16x1xi32>
    %42 = arith.sitofp %41 : vector<16x1xi32> to vector<16x1xf32>
    %c1_i32_21 = arith.constant 1 : i32
    %43 = tpu.dynamic_rotate %31 by %c1_i32_21 dim 0 : vector<16x10xf32>, i32 -> vector<16x10xf32>
    %44 = vector.broadcast %38 : vector<16x1xf32> to vector<16x10xf32>
    %45 = arith.mulf %43, %44 : vector<16x10xf32>
    %46 = tpu.concatenate %45, %31 in 1 : vector<16x10xf32>, vector<16x10xf32> -> vector<16x20xf32>
    %cst_22 = arith.constant dense<0.000000e+00> : vector<16x8xf32>
    %47 = tpu.matmul %46, %4, %cst_22 {dimension_numbers = #tpu.dot_dimension_numbers<[1], [0], [0], [1], [0, 0, 1, 1], [], []>} : vector<16x20xf32>, vector<20x8xf32>, vector<16x8xf32> -> vector<16x8xf32>
    %48 = vector.broadcast %5 : vector<1x8xf32> to vector<16x8xf32>
    %49 = arith.addf %47, %48 : vector<16x8xf32>
    %cst_23 = arith.constant 0.000000e+00 : f32
    %50 = vector.broadcast %cst_23 : f32 to vector<16x8xf32>
    %51 = arith.maximumf %49, %50 : vector<16x8xf32>
    %c1_i32_24 = arith.constant 1 : i32
    %52 = tpu.dynamic_rotate %51 by %c1_i32_24 dim 0 : vector<16x8xf32>, i32 -> vector<16x8xf32>
    %53 = vector.broadcast %38 : vector<16x1xf32> to vector<16x8xf32>
    %54 = arith.mulf %52, %53 : vector<16x8xf32>
    %55 = tpu.concatenate %54, %51 in 1 : vector<16x8xf32>, vector<16x8xf32> -> vector<16x16xf32>
    %cst_25 = arith.constant dense<0.000000e+00> : vector<16x8xf32>
    %56 = tpu.matmul %55, %6, %cst_25 {dimension_numbers = #tpu.dot_dimension_numbers<[1], [0], [0], [1], [0, 0, 1, 1], [], []>} : vector<16x16xf32>, vector<16x8xf32>, vector<16x8xf32> -> vector<16x8xf32>
    %57 = vector.broadcast %7 : vector<1x8xf32> to vector<16x8xf32>
    %58 = arith.addf %56, %57 : vector<16x8xf32>
    %cst_26 = arith.constant 0.000000e+00 : f32
    %59 = vector.broadcast %cst_26 : f32 to vector<16x8xf32>
    %60 = arith.maximumf %58, %59 : vector<16x8xf32>
    %cst_27 = arith.constant dense<0.000000e+00> : vector<16x8xf32>
    %61 = tpu.matmul %31, %8, %cst_27 {dimension_numbers = #tpu.dot_dimension_numbers<[1], [0], [0], [1], [0, 0, 1, 1], [], []>} : vector<16x10xf32>, vector<10x8xf32>, vector<16x8xf32> -> vector<16x8xf32>
    %62 = vector.broadcast %9 : vector<1x8xf32> to vector<16x8xf32>
    %63 = arith.addf %61, %62 : vector<16x8xf32>
    %64 = arith.addf %60, %63 : vector<16x8xf32>
    %cst_28 = arith.constant 0.000000e+00 : f32
    %65 = vector.broadcast %cst_28 : f32 to vector<16x8xf32>
    %66 = arith.maximumf %64, %65 : vector<16x8xf32>
    %c2_i32_29 = arith.constant 2 : i32
    %67 = tpu.dynamic_rotate %66 by %c2_i32_29 dim 0 : vector<16x8xf32>, i32 -> vector<16x8xf32>
    %68 = vector.broadcast %42 : vector<16x1xf32> to vector<16x8xf32>
    %69 = arith.mulf %67, %68 : vector<16x8xf32>
    %70 = tpu.concatenate %69, %66 in 1 : vector<16x8xf32>, vector<16x8xf32> -> vector<16x16xf32>
    %cst_30 = arith.constant dense<0.000000e+00> : vector<16x8xf32>
    %71 = tpu.matmul %70, %10, %cst_30 {dimension_numbers = #tpu.dot_dimension_numbers<[1], [0], [0], [1], [0, 0, 1, 1], [], []>} : vector<16x16xf32>, vector<16x8xf32>, vector<16x8xf32> -> vector<16x8xf32>
    %72 = vector.broadcast %11 : vector<1x8xf32> to vector<16x8xf32>
    %73 = arith.addf %71, %72 : vector<16x8xf32>
    %cst_31 = arith.constant 0.000000e+00 : f32
    %74 = vector.broadcast %cst_31 : f32 to vector<16x8xf32>
    %75 = arith.maximumf %73, %74 : vector<16x8xf32>
    %c2_i32_32 = arith.constant 2 : i32
    %76 = tpu.dynamic_rotate %75 by %c2_i32_32 dim 0 : vector<16x8xf32>, i32 -> vector<16x8xf32>
    %77 = vector.broadcast %42 : vector<16x1xf32> to vector<16x8xf32>
    %78 = arith.mulf %76, %77 : vector<16x8xf32>
    %79 = tpu.concatenate %78, %75 in 1 : vector<16x8xf32>, vector<16x8xf32> -> vector<16x16xf32>
    %cst_33 = arith.constant dense<0.000000e+00> : vector<16x8xf32>
    %80 = tpu.matmul %79, %12, %cst_33 {dimension_numbers = #tpu.dot_dimension_numbers<[1], [0], [0], [1], [0, 0, 1, 1], [], []>} : vector<16x16xf32>, vector<16x8xf32>, vector<16x8xf32> -> vector<16x8xf32>
    %81 = vector.broadcast %13 : vector<1x8xf32> to vector<16x8xf32>
    %82 = arith.addf %80, %81 : vector<16x8xf32>
    %cst_34 = arith.constant 0.000000e+00 : f32
    %83 = vector.broadcast %cst_34 : f32 to vector<16x8xf32>
    %84 = arith.maximumf %82, %83 : vector<16x8xf32>
    %85 = arith.addf %84, %66 : vector<16x8xf32>
    %cst_35 = arith.constant 0.000000e+00 : f32
    %86 = vector.broadcast %cst_35 : f32 to vector<16x8xf32>
    %87 = arith.maximumf %85, %86 : vector<16x8xf32>
    %cst_36 = arith.constant dense<0.000000e+00> : vector<16x1xf32>
    %88 = tpu.matmul %87, %14, %cst_36 {dimension_numbers = #tpu.dot_dimension_numbers<[1], [0], [0], [1], [0, 0, 1, 1], [], []>} : vector<16x8xf32>, vector<8x1xf32>, vector<16x1xf32> -> vector<16x1xf32>
    %89 = vector.broadcast %15 : vector<1x1xf32> to vector<16x1xf32>
    %90 = arith.addf %88, %89 : vector<16x1xf32>
    %c0_37 = arith.constant 0 : index
    %c0_38 = arith.constant 0 : index
    %91 = vector.load %arg3[%c0_37, %c0_38] : memref<16x1xf32, #tpu.memory_space<vmem>>, vector<16x1xf32>
    tpu.vector_store %arg3[%c0_37, %c0_38], %90 {strides = array<i32>} : memref<16x1xf32, #tpu.memory_space<vmem>>, vector<16x1xf32>,
    return
  }
  func.func @transform_0(%arg0: i32) -> (i32, i32) {
    %c0_i32 = arith.constant 0 : i32
    %c0_i32_0 = arith.constant 0 : i32
    %c0_i32_1 = arith.constant 0 : i32
    return %c0_i32, %c0_i32_0 : i32, i32
  }
  func.func @transform_1(%arg0: i32) -> (i32, i32) {
    %c0_i32 = arith.constant 0 : i32
    %c0_i32_0 = arith.constant 0 : i32
    %c0_i32_1 = arith.constant 0 : i32
    return %c0_i32, %c0_i32_0 : i32, i32
  }
  func.func @transform_2(%arg0: i32) -> (i32, i32) {
    %c0_i32 = arith.constant 0 : i32
    %c0_i32_0 = arith.constant 0 : i32
    %c0_i32_1 = arith.constant 0 : i32
    return %c0_i32, %c0_i32_0 : i32, i32
  }
}

</mosaic_0001>

<bundles_post_ra>
// kernel: ftcn_forward.1
= control target key start
LH: loop header
LB: loop body
LE: loop exit
PB: predicated region body
PF: predicated region fallthrough
CT: control target
= control target key end

     0   :  { %vm51_vm0 = vcmask 523264   ;;  %vm166_vm1 = vcmask 1043456   ;;  %vm1086_vm2 = vmmov 1   ;;  %vm159_vm4 = vcmask 228352   ;;  %s1087_s20 = smov 2   ;;  %s1088_s23 = smov 10   ;;  %s1312_s1 = inlined_call_operand.vmem [shape: f32[256,128], index: 1, kind: input, shape index: {}]   ;;  %s1313_s0 = inlined_call_operand.vmem [shape: f32[32,64], index: 0, kind: input, shape index: {}]   ;;  %s1314_s2 = inlined_call_operand.vmem [shape: f32[16,1], index: 2, kind: output, shape index: {}]  }
   0x1   :  { %v11_v0 = vld [vmem:[%s1312_s1] sm:$0xff]  ;;  %v12_v1 = vld [vmem:[%s1312_s1 + $0x8] sm:$0xff]  ;;  %v13_v2 = vld [vmem:[%s1312_s1 + $0x10] sm:$0xff]  ;;  %vm255_vm5 = vcmask 15360   ;;  %v258_v52 = vlaneseq  ;;  %v1089_v59 = vmov 0.0   ;;  %vm290_vm9 = vcmask 80896  }
   0x2   :  { %v1033_v3 = vpack.c.bf16 %v12_v1, %v11_v0  ;;  %v14_v4 = vld [vmem:[%s1312_s1 + $0x18] sm:$0xff]  ;;  %v15_v6 = vld [vmem:[%s1312_s1 + $0x20] sm:$0xff]  ;;  %v16_v7 = vld [vmem:[%s1312_s1 + $0x28] sm:$0xff]  ;;  %vm297_vm10 = vcmask 162816   ;;  %vm497_vm11 = vcmask 1041408   ;;  %s1090_s6 = smov 8  }
   0x3   :  { %v1037_v5 = vpack.c.bf16 %v14_v4, %v13_v2  ;;  %v1127_v8 = vld [vmem:[%s1313_s0] sm:$0xff]  ;;  %v1041_v9 = vpack.c.bf16 %v16_v7, %v15_v6  ;;  %v17_v10 = vld [vmem:[%s1312_s1 + $0x30] sm:$0xff]  ;;  %v18_v11 = vld [vmem:[%s1312_s1 + $0x38] sm:$0xff]  ;;  %v1187_v53 = vshrl.u32 %v258_v52, 7  ;;  %vm398_vm13 = vcmask 64512  }
   0x4   :  { %1034 = vmatprep.subr.bf16.mxu0 %v1033_v3  ;;  %974 = vmatprep.mubr.msk.f32.mxu0 %vm51_vm0, %v1127_v8  ;;  %v1045_v12 = vpack.c.bf16 %v18_v11, %v17_v10  ;;  %v44_v13 = vld [vmem:[%s1313_s0 + $0x8] sm:$0xff]  ;;  %v45_v14 = vld [vmem:[%s1313_s0 + $0x10] sm:$0xff]  ;;  %v46_v15 = vld [vmem:[%s1313_s0 + $0x18] sm:$0xff]  ;;  %vm405_vm14 = vcmask 130048  }
   0x5   :  { %1036 = vmatpush3.bf16.msra.mxu0 %v1033_v3  ;;  %v20_v16 = vld [vmem:[%s1312_s1 + $0x48] sm:$0xff]  ;;  %v21_v17 = vld [vmem:[%s1312_s1 + $0x50] sm:$0xff]  ;;  %v22_v19 = vld [vmem:[%s1312_s1 + $0x58] sm:$0xff]  ;;  %v261_v54 = vand.u32 7, %v1187_v53  ;;  %v1191_v55 = vadd.s32 8, %v1187_v53  ;;  %vm277_vm7 = vcmp.lt.s32.totalorder %v1187_v53, 1 }
   0x6   :  { %1038 = vmatprep.subr.bf16.mxu0 %v1037_v5  ;;  %v1049_v18 = vpack.c.bf16 %v21_v17, %v20_v16  ;;  %v23_v20 = vld [vmem:[%s1312_s1 + $0x60] sm:$0xf]  ;;  %vm1054_vm3 = vmpackc.low %vm166_vm1, %vm1086_vm2  ;;  %v25_v37 = vld [vmem:[%s1312_s1 + $0x70] sm:$0xff]  ;;  %vm582_vm15 = vcmp.lt.s32.totalorder %v1187_v53, 2 }
   0x7   :  { %v1053_v21 = vpack.c.bf16 %v23_v20, %v22_v19  ;;  %v883_v23 = vld [vmem:[%s1312_s1 + $0x40] ss:$0 sm:$0xff]  ;;  %v26_v38 = vld [vmem:[%s1312_s1 + $0x78] sm:$0xff]  ;;  %v888_v39 = vld [vmem:[%s1312_s1 + $0x68] ss:$0 sm:$0xff]  ;;  %vm263_vm6 = vcmp.ge.s32.totalorder %v261_v54, 1 }
   0x8   :  { %1050 = vmatprep.subr.bf16.mxu1 %v1049_v18  ;;  %v1059_v40 = vpack.c.bf16 %v26_v38, %v25_v37  ;;  %v27_v47 = vld [vmem:[%s1312_s1 + $0x80] sm:$0xf]  ;;  %v262_v57 = vand.u32 7, %v1191_v55  ;;  %v892_v60 = vsel %vm263_vm6, 1.0, %v1089_v59  ;;  %v29_v6 = vld [vmem:[%s1312_s1 + $0x90] sm:$0xff]  ;;  %v30_v7 = vld [vmem:[%s1312_s1 + $0x98] sm:$0xff] }
   0x9   :  { %1040 = vmatpush3.bf16.msra.mxu0 %v1037_v5  ;;  %1052 = vmatpush3.bf16.msra.mxu1 %v1049_v18  ;;  %v33_v10 = vld [vmem:[%s1312_s1 + $0xb0] sm:$0x3]  ;;  %vm1222_vm12 = vmpackc.low %vm497_vm11, %vm1086_vm2  ;;  %v903_v38 = vld [vmem:[%s1312_s1 + $0xb8] ss:$0 sm:$0xff]  ;;  %vm876_vm2 = vcmask 7168  }
   0xa   :  { %1042 = vmatprep.subr.bf16.mxu0 %v1041_v9  ;;  %1055 = vmatprep.subr.msk.bf16.mxu1 %vm1054_vm3, %v1053_v21  ;;  %vm264_vm8 = vcmp.ge.s32.totalorder %v262_v57, 1  ;;  %v38_v55 = vld [vmem:[%s1312_s1 + $0xd8] sm:$0xff]  ;;  %v910_v53 = vld [vmem:[%s1312_s1 + $0xe8] ss:$0 sm:$0xff] }
   0xb   :  { %v893_v0 = vsel %vm264_vm8, 1.0, %v1089_v59 }
   0xd   :  { %1044 = vmatpush3.bf16.msra.mxu0 %v1041_v9  ;;  %1058 = vmatpush3.bf16.msk.msra.mxu1 %vm1054_vm3, %v1053_v21  ;;  %v32_v9 = vld [vmem:[%s1312_s1 + $0xa8] sm:$0xff] }
   0xe   :  { %1046 = vmatprep.subr.bf16.mxu0 %v1045_v12  ;;  %1060 = vmatprep.subr.bf16.mxu1 %v1059_v40  ;;  %v1067_v11 = vpack.c.bf16 %v33_v10, %v32_v9 }
  0x11   :  { %1048 = vmatpush3.bf16.msra.mxu0 %v1045_v12 }
  0x14   :  { %975 = vmatmul.mubr.msk.f32.vlgmr.msra.gmra.mrb[0].mxu0 %vm51_vm0, %v44_v13 }
  0x15   :  { %977 = vmatprep.mubr.msk.f32.mxu0 %vm51_vm0, %v45_v14 }
  0x18   :  { %978 = vmatmul.mubr.msk.f32.gmra.mrb[2].mxu0 %vm51_vm0, %v46_v15  ;;  %vm269_vm0 = vcmp.ge.s32.totalorder %v261_v54, 2 }
  0xe7   :  { %v976_v22 = vpop.f32.mrb[0].mxu0 }
  0xe8   :  { %v130_v24 = vpop.f32.mrb[1].mxu0  ;;  %v136_v25 = vadd.f32 %v976_v22, %v883_v23 }
  0xe9   :  { %v131_v26 = vadd.f32 %v883_v23, %v130_v24 }
  0xea   :  { %v150_v31 = vmax.f32 %v136_v25, 0.0 }
  0xeb   :  { %v979_v27 = vpop.f32.mrb[2].mxu0  ;;  %v149_v33 = vmax.f32 %v131_v26, 0.0 }
  0xec   :  { %v146_v28 = vadd.f32 %v979_v27, %v883_v23  ;;  %v140_v29 = vpop.f32.mrb[3].mxu0 }
  0xed   :  { %v141_v30 = vadd.f32 %v883_v23, %v140_v29 }
  0xee   :  { %v152_v32 = vmax.f32 %v146_v28, 0.0 }
  0xef   :  { %v151_v34 = vmax.f32 %v141_v30, 0.0  ;;  %v35_v30 = vld [vmem:[%s1312_s1 + $0xc0] sm:$0xff] }
  0xf0   :  { %v154_v35 = vmax.f32 %v150_v31, %v152_v32  ;;  %v36_v31 = vld [vmem:[%s1312_s1 + $0xc8] sm:$0xff] }
  0xf1   :  { %v153_v36 = vmax.f32 %v149_v33, %v151_v34  ;;  %v1073_v32 = vpack.c.bf16 %v36_v31, %v35_v30  ;;  %v900_v33 = vld [vmem:[%s1312_s1 + $0xa0] ss:$0 sm:$0xff] }
  0xf3   :  { %988 = vmatprep.mubr.msk.f32.mxu1 %vm159_vm4, %v153_v36  ;;  %1074 = vmatprep.subr.bf16.mxu0 %v1073_v32 }
  0xf4   :  { %989 = vmatmul.mubr.msk.f32.vlgmr.msra.gmra.mrb[0].mxu1 %vm159_vm4, %v154_v35  ;;  %1076 = vmatpush3.bf16.msra.mxu0 %v1073_v32 }
  0xf5   :  { %1062 = vmatpush3.bf16.msra.mxu1 %v1059_v40 }
  0xf6   :  { %995 = vmatprep.subr.msk.mxu1 %vm166_vm1, %v27_v47 }
  0xf9   :  { %996 = vmatpush3.msk.msra.mxu1 %vm166_vm1, %v27_v47  ;;  %vm270_vm1 = vcmp.ge.s32.totalorder %v262_v57, 2  ;;  %v39_v57 = vld [vmem:[%s1312_s1 + $0xe0] sm:$0xff] }
 0x1c7   :  { %v990_v41 = vpop.f32.mrb[0].mxu1 }
 0x1c8   :  { %v236_v42 = vpop.f32.mrb[1].mxu1  ;;  %v242_v44 = vadd.f32 %v990_v41, %v888_v39 }
 0x1c9   :  { %v237_v43 = vadd.f32 %v888_v39, %v236_v42 }
 0x1ca   :  { %v246_v46 = vmax.f32 %v242_v44, 0.0 }
 0x1cb   :  { %v245_v45 = vmax.f32 %v237_v43, 0.0 }
 0x1cd   :  { %249 = vrot.lane.b32.xlu0 %v245_v45, %s1087_s20 }
 0x1d1   :  { %251 = vrot.lane.b32.xlu0 %v246_v46, %s1087_s20 }
 0x23f   :  { %v250_v48 = vpop.permute.xlu0 %249 }
 0x240   :  { %v1181_v49 = vsel %vm255_vm5, %v1127_v8, %v250_v48  ;;  %v1063_v8 = vpack.c.bf16 %v30_v7, %v29_v6 }
 0x241   :  { %284 = vrot.lane.b32.xlu1 %v1181_v49, %s1088_s23  ;;  %v275_v58 = vrot.slane %v1181_v49, 7 }
 0x242   :  { %1064 = vmatprep.subr.bf16.mxu1 %v1063_v8 }
 0x243   :  { %v252_v50 = vpop.permute.xlu0 %251 }
 0x244   :  { %v1184_v51 = vsel %vm255_vm5, %v44_v13, %v252_v50  ;;  %v896_v13 = vld [vmem:[%s1312_s1 + $0x88] ss:$0 sm:$0xff] }
 0x245   :  { %286 = vrot.lane.b32.xlu1 %v1184_v51, %s1088_s23  ;;  %v276_v56 = vrot.slane %v1184_v51, 7 }
 0x247   :  { %v279_v61 = vsel %vm277_vm7, %v276_v56, %v275_v58  ;;  %v278_v1 = vsel %vm277_vm7, %v275_v58, %v276_v56  ;;  %v895_v56 = vsel %vm270_vm1, 1.0, %v1089_v59 }
 0x248   :  { %v280_v62 = vmul.f32 %v892_v60, %v279_v61  ;;  %v281_v3 = vmul.f32 %v893_v0, %v278_v1  ;;  %v907_v1 = vld [vmem:[%s1312_s1 + $0xd0] ss:$0 sm:$0xff] }
 0x2b3   :  { %v285_v63 = vpop.permute.xlu1 %284 }
 0x2b4   :  { %v291_v2 = vsel %vm290_vm9, %v280_v62, %v285_v63 }
 0x2b5   :  { %997 = vmatprep.mubr.msk.f32.mxu1 %vm297_vm10, %v291_v2 }
 0x2b7   :  { %v287_v4 = vpop.permute.xlu1 %286 }
 0x2b8   :  { %v292_v5 = vsel %vm290_vm9, %v281_v3, %v287_v4 }
 0x2b9   :  { %998 = vmatmul.mubr.msk.f32.vlgmr.msra.gmra.mrb[2].mxu1 %vm297_vm10, %v292_v5 }
 0x2ba   :  { %1066 = vmatpush3.bf16.msra.mxu1 %v1063_v8 }
 0x2bb   :  { %1069 = vmatprep.subr.msk.bf16.mxu1 %vm1222_vm12, %v1067_v11 }
 0x38c   :  { %v999_v14 = vpop.f32.mrb[2].mxu1 }
 0x38d   :  { %v379_v15 = vadd.f32 %v999_v14, %v896_v13  ;;  %v373_v16 = vpop.f32.mrb[3].mxu1 }
 0x38e   :  { %v374_v17 = vadd.f32 %v896_v13, %v373_v16 }
 0x38f   :  { %v383_v18 = vmax.f32 %v379_v15, 0.0 }
 0x390   :  { %v382_v19 = vmax.f32 %v374_v17, 0.0 }
 0x391   :  { %v385_v20 = vrot.slane %v383_v18, 7  ;;  %394 = vrot.lane.b32.xlu1 %v383_v18, %s1090_s6  ;;  %v41_v18 = vld [vmem:[%s1312_s1 + $0xf0] sm:$0xff] }
 0x392   :  { %v384_v21 = vrot.slane %v382_v19, 7  ;;  %392 = vrot.lane.b32.xlu0 %v382_v19, %s1090_s6  ;;  %1028 = vmatprep.subr.mxu0 %v41_v18 }
 0x394   :  { %v386_v22 = vsel %vm277_vm7, %v384_v21, %v385_v20  ;;  %v387_v23 = vsel %vm277_vm7, %v385_v20, %v384_v21 }
 0x395   :  { %v388_v25 = vmul.f32 %v892_v60, %v387_v23  ;;  %v389_v26 = vmul.f32 %v893_v0, %v386_v22 }
 0x403   :  { %v395_v24 = vpop.permute.xlu1 %394 }
 0x404   :  { %v393_v27 = vpop.permute.xlu0 %392  ;;  %v400_v29 = vsel %vm398_vm13, %v389_v26, %v395_v24 }
 0x405   :  { %v399_v28 = vsel %vm398_vm13, %v388_v25, %v393_v27 }
 0x406   :  { %1004 = vmatprep.mubr.msk.f32.mxu1 %vm405_vm14, %v399_v28 }
 0x407   :  { %1005 = vmatmul.mubr.msk.f32.vlgmr.msra.gmra.mrb[4].mxu1 %vm405_vm14, %v400_v29  ;;  %v913_v29 = vld [vmem:[%s1312_s1 + $0xf8] ss:$0 sm:$0xff] }
 0x408   :  { %1072 = vmatpush3.bf16.msk.msra.mxu1 %vm1222_vm12, %v1067_v11  ;;  %1011 = vmatprep.mubr.msk.f32.mxu1 %vm290_vm9, %v1181_v49 }
 0x40b   :  { %1012 = vmatmul.mubr.msk.f32.vlgmr.msra.gmra.mrb[6].mxu1 %vm290_vm9, %v1184_v51  ;;  %v894_v51 = vsel %vm269_vm0, 1.0, %v1089_v59  ;;  %v1077_v59 = vpack.c.bf16 %v39_v57, %v38_v55 }
 0x40d   :  { %1078 = vmatprep.subr.bf16.mxu1 %v1077_v59 }
 0x40e   :  { %1080 = vmatpush3.bf16.msra.mxu1 %v1077_v59 }
 0x4da   :  { %v1006_v34 = vpop.f32.mrb[4].mxu1 }
 0x4db   :  { %v484_v35 = vadd.f32 %v1006_v34, %v900_v33  ;;  %v478_v36 = vpop.f32.mrb[5].mxu1 }
 0x4dc   :  { %v479_v37 = vadd.f32 %v900_v33, %v478_v36 }
 0x4dd   :  { %v488_v40 = vmax.f32 %v484_v35, 0.0 }
 0x4de   :  { %v1013_v39 = vpop.f32.mrb[6].mxu1  ;;  %v487_v43 = vmax.f32 %v479_v37, 0.0 }
 0x4df   :  { %v573_v41 = vadd.f32 %v1013_v39, %v903_v38  ;;  %v567_v42 = vpop.f32.mrb[7].mxu1 }
 0x4e0   :  { %v568_v44 = vadd.f32 %v903_v38, %v567_v42 }
 0x4e1   :  { %v577_v45 = vadd.f32 %v573_v41, %v488_v40 }
 0x4e2   :  { %v576_v46 = vadd.f32 %v568_v44, %v487_v43 }
 0x4e3   :  { %v579_v47 = vmax.f32 %v577_v45, 0.0 }
 0x4e4   :  { %v578_v48 = vmax.f32 %v576_v46, 0.0 }
 0x4e5   :  { %591 = vrot.lane.b32.xlu1 %v579_v47, %s1090_s6  ;;  %v581_v49 = vrot.slane %v579_v47, 6 }
 0x4e6   :  { %589 = vrot.lane.b32.xlu0 %v578_v48, %s1090_s6  ;;  %v580_v50 = vrot.slane %v578_v48, 6 }
 0x4e8   :  { %v584_v52 = vsel %vm582_vm15, %v581_v49, %v580_v50  ;;  %v583_v58 = vsel %vm582_vm15, %v580_v50, %v581_v49 }
 0x4e9   :  { %v585_v61 = vmul.f32 %v894_v51, %v584_v52  ;;  %v586_v62 = vmul.f32 %v895_v56, %v583_v58 }
 0x557   :  { %v592_v60 = vpop.permute.xlu1 %591 }
 0x558   :  { %v590_v63 = vpop.permute.xlu0 %589  ;;  %v596_v54 = vsel %vm398_vm13, %v586_v62, %v592_v60 }
 0x559   :  { %v595_v0 = vsel %vm398_vm13, %v585_v61, %v590_v63 }
 0x55a   :  { %1018 = vmatprep.mubr.msk.f32.mxu0 %vm405_vm14, %v595_v0 }
 0x55b   :  { %1019 = vmatmul.mubr.msk.f32.vlgmr.msra.gmra.mrb[4].mxu0 %vm405_vm14, %v596_v54 }
 0x55c   :  { %1029 = vmatpush3.msra.mxu0 %v41_v18 }
 0x62e   :  { %v1020_v2 = vpop.f32.mrb[4].mxu0 }
 0x62f   :  { %v679_v3 = vadd.f32 %v1020_v2, %v907_v1  ;;  %v673_v4 = vpop.f32.mrb[5].mxu0 }
 0x630   :  { %v674_v5 = vadd.f32 %v907_v1, %v673_v4 }
 0x631   :  { %v683_v6 = vmax.f32 %v679_v3, 0.0 }
 0x632   :  { %v682_v7 = vmax.f32 %v674_v5, 0.0 }
 0x633   :  { %v685_v8 = vrot.slane %v683_v6, 6  ;;  %694 = vrot.lane.b32.xlu1 %v683_v6, %s1090_s6 }
 0x634   :  { %v684_v9 = vrot.slane %v682_v7, 6  ;;  %692 = vrot.lane.b32.xlu0 %v682_v7, %s1090_s6 }
 0x636   :  { %v686_v10 = vsel %vm582_vm15, %v684_v9, %v685_v8  ;;  %v687_v11 = vsel %vm582_vm15, %v685_v8, %v684_v9 }
 0x637   :  { %v688_v13 = vmul.f32 %v894_v51, %v687_v11  ;;  %v689_v14 = vmul.f32 %v895_v56, %v686_v10 }
 0x6a5   :  { %v695_v12 = vpop.permute.xlu1 %694 }
 0x6a6   :  { %v693_v15 = vpop.permute.xlu0 %692  ;;  %v699_v17 = vsel %vm398_vm13, %v689_v14, %v695_v12 }
 0x6a7   :  { %v698_v16 = vsel %vm398_vm13, %v688_v13, %v693_v15 }
 0x6a8   :  { %1025 = vmatprep.mubr.msk.f32.mxu1 %vm405_vm14, %v698_v16 }
 0x6a9   :  { %1026 = vmatmul.mubr.msk.f32.vlgmr.msra.gmra.mrb[8].mxu1 %vm405_vm14, %v699_v17 }
 0x77c   :  { %v1027_v19 = vpop.f32.mrb[8].mxu1 }
 0x77d   :  { %v782_v20 = vadd.f32 %v1027_v19, %v910_v53  ;;  %v776_v21 = vpop.f32.mrb[9].mxu1 }
 0x77e   :  { %v777_v22 = vadd.f32 %v910_v53, %v776_v21 }
 0x77f   :  { %v786_v23 = vmax.f32 %v782_v20, 0.0 }
 0x780   :  { %v785_v24 = vmax.f32 %v777_v22, 0.0 }
 0x781   :  { %v788_v25 = vadd.f32 %v786_v23, %v579_v47 }
 0x782   :  { %v787_v26 = vadd.f32 %v785_v24, %v578_v48 }
 0x783   :  { %v790_v28 = vmax.f32 %v788_v25, 0.0 }
 0x784   :  { %v789_v27 = vmax.f32 %v787_v26, 0.0 }
 0x786   :  { %1030 = vmatprep.mubr.msk.f32.mxu0 %vm398_vm13, %v789_v27 }
 0x787   :  { %1031 = vmatmul.mubr.msk.f32.vlgmr.msra.gmra.mrb[6].mxu0 %vm398_vm13, %v790_v28 }
 0x85a   :  { %v1032_v30 = vpop.f32.mrb[6].mxu0 }
 0x85b   :  { %v873_v31 = vadd.f32 %v1032_v30, %v913_v29  ;;  %v867_v32 = vpop.f32.mrb[7].mxu0 }
 0x85c   :  { %v868_v33 = vadd.f32 %v913_v29, %v867_v32 }
 0x85d   :  { %878 = vst.msk [vmem:[%s1314_s2 + $0x8] sm:$0xff] %vm876_vm2, %v873_v31 }
 0x85e   :  { %877 = vst.msk [vmem:[%s1314_s2] sm:$0xff] %vm876_vm2, %v868_v33 }

</bundles_post_ra>
